<compile_context>
chip_gen: v7x
topology: tpu7x:2x2x1
jax: 0.10.0
libtpu: 0.0.40
codegen_flags: <defaults>
</compile_context>

<pallas_src>
import functools

import jax
import jax.numpy as jnp
from jax.experimental import pallas as pl
from jax.experimental.pallas import tpu as pltpu


def _ce_kernel(x_ref, t_ref, o_ref, *, C, tp, p_valid, needs_mask):
    x = x_ref[0]                               # (C, tp): classes on sublanes, native dtype
    t = t_ref[0].astype(jnp.int32)             # (1, tp): targets, lane-dense

    # Numerically stable: shift by the per-pixel max in the native dtype,
    # then cast the (<= 0) shifted logits to f32 for exp/log accumulation.
    m = jnp.max(x, axis=0, keepdims=True)                              # (1, tp)
    xs = (x - m).astype(jnp.float32)                                   # (C, tp)
    lse = jnp.log(jnp.sum(jnp.exp(xs), axis=0, keepdims=True))         # (1, tp)

    # Gather the shifted logit of the target class via a sublane-iota one-hot
    # select (NaN-safe: select, not a 0/1-mask multiply).
    cls = jax.lax.broadcasted_iota(jnp.int32, (C, tp), 0)
    x_t = jnp.sum(jnp.where(cls == t, xs, 0.0), axis=0, keepdims=True)  # (1, tp)

    per_pix = lse - x_t                        # (1, tp) = -log_softmax[target]

    if needs_mask:
        j = pl.program_id(1)
        last = pl.num_programs(1) - 1

        @pl.when(j == last)                    # only the ragged last tile is masked
        def _():
            pix = jax.lax.broadcasted_iota(jnp.int32, (1, tp), 1) + j * tp
            # Must stay a where/select: the ragged tail holds unspecified
            # (possibly NaN/Inf) data.
            v = jnp.where(pix < p_valid, per_pix, 0.0)
            o_ref[...] = jnp.sum(v, axis=1, keepdims=True)

        @pl.when(j != last)
        def _():
            o_ref[...] = jnp.sum(per_pix, axis=1, keepdims=True)
    else:
        o_ref[...] = jnp.sum(per_pix, axis=1, keepdims=True)


def cross_entropy_loss_2d(inputs, targets, tp=None):
    """inputs: (N, C, H, W) float; targets: (N, H, W) int. Returns scalar mean loss."""
    N, C, H, W = inputs.shape
    P = H * W

    if tp is None:
        # Lane-dense pixel tile sized for ~4 MiB of f32 working set per grid
        # step (sublanes pad to 8, hence max(C, 8)).  No artificial 4096 cap:
        # big tiles are what get v5e/v6e to >85% of HBM roofline and amortize
        # the per-step cost on v7x.
        budget_bytes = 4 * 1024 * 1024
        cap = max(128, (budget_bytes // (max(C, 8) * 4)) // 128 * 128)
        tp = min(pl.cdiv(P, 128) * 128, cap)
    assert tp % 128 == 0 and tp >= 128, "pixel tile must be a multiple of 128"

    num_tiles = pl.cdiv(P, tp)
    needs_mask = (P % tp) != 0                 # ragged last tile -> in-kernel mask

    x = inputs.reshape(N, C, P)                # free reshape, original dtype on the wire
    t = targets.reshape(N, 1, P)               # keep caller's integer dtype

    kernel = functools.partial(_ce_kernel, C=C, tp=tp, p_valid=P,
                               needs_mask=needs_mask)

    partials = pl.pallas_call(
        kernel,
        out_shape=jax.ShapeDtypeStruct((N, num_tiles, 1, 1), jnp.float32),
        grid_spec=pltpu.PrefetchScalarGridSpec(
            num_scalar_prefetch=0,
            grid=(N, num_tiles),
            in_specs=[
                pl.BlockSpec((1, C, tp), lambda n, j: (n, 0, j)),
                pl.BlockSpec((1, 1, tp), lambda n, j: (n, 0, j)),
            ],
            # Per-(n, j) partial sums: no cross-step carry, so both axes can
            # be megacore-parallel and the final reduction is a wrapper tree-sum.
            out_specs=pl.BlockSpec((None, None, 1, 1), lambda n, j: (n, j, 0, 0)),
        ),
        compiler_params=pltpu.CompilerParams(
            dimension_semantics=("parallel", "parallel"),
            vmem_limit_bytes=48 * 1024 * 1024,
        ),
    )(x, t)

    # size_average=True -> mean over all N*H*W pixels (single divide, once).
    return jnp.sum(partials) / jnp.float32(N * P)


def _reference(inputs, targets):
    logp = jax.nn.log_softmax(inputs.astype(jnp.float32), axis=1)
    return -jnp.mean(jnp.take_along_axis(logp, targets[:, None, :, :], axis=1))


if __name__ == "__main__":
    key = jax.random.PRNGKey(0)

    # Test 1: spec shape, f32, evenly-divisible tiling.
    k1, k2, key = (*jax.random.split(key, 2), key)
    N, C, H, W = 2, 4, 16, 16
    x = jax.random.normal(k1, (N, C, H, W), dtype=jnp.float32)
    t = jax.random.randint(k2, (N, H, W), 0, C, dtype=jnp.int32)
    loss = jax.block_until_ready(cross_entropy_loss_2d(x, t))
    ref = _reference(x, t)
    assert jnp.allclose(loss, ref, atol=1e-5, rtol=1e-5), (loss, ref)

    # Test 2: ragged pixel count (P=130 < tile), bf16 logits (no-pad path).
    k1, k2, key = (*jax.random.split(key, 2), key)
    N, C, H, W = 1, 5, 10, 13
    x = jax.random.normal(k1, (N, C, H, W), dtype=jnp.float32).astype(jnp.bfloat16)
    t = jax.random.randint(k2, (N, H, W), 0, C, dtype=jnp.int32)
    loss = jax.block_until_ready(cross_entropy_loss_2d(x, t))
    ref = _reference(x, t)
    assert jnp.allclose(loss, ref, atol=5e-2, rtol=5e-2), (loss, ref)

    # Test 3: multiple tiles with a ragged last tile (explicit tp=128), f32.
    k1, k2, key = (*jax.random.split(key, 2), key)
    N, C, H, W = 2, 4, 12, 12          # P = 144 -> tiles of 128 + ragged 16
    x = jax.random.normal(k1, (N, C, H, W), dtype=jnp.float32)
    t = jax.random.randint(k2, (N, H, W), 0, C, dtype=jnp.int32)
    loss = jax.block_until_ready(cross_entropy_loss_2d(x, t, tp=128))
    ref = _reference(x, t)
    assert jnp.allclose(loss, ref, atol=1e-5, rtol=1e-5), (loss, ref)

    print("KERNEL_OK")
</pallas_src>

<mosaic_0001>
module attributes {stable_mosaic.version = 11 : i64} {
  func.func @_ce_kernel(%arg0: i32, %arg1: i32, %arg2: memref<1x4x256xf32, #tpu.memory_space<vmem>>, %arg3: memref<1x1x256xi32, #tpu.memory_space<vmem>>, %arg4: memref<1x1x1x1xf32, #tpu.memory_space<vmem>>) attributes {dimension_semantics = [#tpu.dimension_semantics<parallel>, #tpu.dimension_semantics<parallel>], iteration_bounds = array<i64: 2, 1>, scalar_prefetch = 0 : i64, scratch_operands = 0 : i64, tpu.core_type = #tpu.core_type<tc>, window_params = [{transform_indices = @transform_0, window_bounds = array<i64: 1, 4, 256>}, {transform_indices = @transform_1, window_bounds = array<i64: 1, 1, 256>}, {transform_indices = @transform_2, window_bounds = array<i64: 1, 1, 1, 1>}]} {
    %c0 = arith.constant 0 : index
    %c0_0 = arith.constant 0 : index
    %c0_1 = arith.constant 0 : index
    %0 = vector.load %arg2[%c0, %c0_0, %c0_1] : memref<1x4x256xf32, #tpu.memory_space<vmem>>, vector<1x4x256xf32>
    %1 = vector.shape_cast %0 : vector<1x4x256xf32> to vector<4x256xf32>
    %c0_2 = arith.constant 0 : index
    %c0_3 = arith.constant 0 : index
    %c0_4 = arith.constant 0 : index
    %2 = vector.load %arg3[%c0_2, %c0_3, %c0_4] : memref<1x1x256xi32, #tpu.memory_space<vmem>>, vector<1x1x256xi32>
    %3 = vector.shape_cast %2 : vector<1x1x256xi32> to vector<1x256xi32>
    %cst = arith.constant dense<0xFF800000> : vector<256xf32>
    %4 = vector.multi_reduction <maximumf>, %1, %cst [0] : vector<4x256xf32> to vector<256xf32>
    %5 = vector.shape_cast %4 : vector<256xf32> to vector<1x256xf32>
    %6 = vector.broadcast %5 : vector<1x256xf32> to vector<4x256xf32>
    %7 = arith.subf %1, %6 : vector<4x256xf32>
    %8 = math.exp %7 : vector<4x256xf32>
    %cst_5 = arith.constant dense<0.000000e+00> : vector<256xf32>
    %9 = vector.multi_reduction <add>, %8, %cst_5 [0] : vector<4x256xf32> to vector<256xf32>
    %10 = vector.shape_cast %9 : vector<256xf32> to vector<1x256xf32>
    %11 = math.log %10 : vector<1x256xf32>
    %12 = tpu.iota {dimensions = array<i32: 0>} : vector<4x256xi32>
    %13 = vector.broadcast %3 : vector<1x256xi32> to vector<4x256xi32>
    %14 = arith.cmpi eq, %12, %13 : vector<4x256xi32>
    %cst_6 = arith.constant 0.000000e+00 : f32
    %15 = vector.broadcast %cst_6 : f32 to vector<4x256xf32>
    %16 = arith.select %14, %7, %15 : vector<4x256xi1>, vector<4x256xf32>
    %cst_7 = arith.constant dense<0.000000e+00> : vector<256xf32>
    %17 = vector.multi_reduction <add>, %16, %cst_7 [0] : vector<4x256xf32> to vector<256xf32>
    %18 = vector.shape_cast %17 : vector<256xf32> to vector<1x256xf32>
    %19 = arith.subf %11, %18 : vector<1x256xf32>
    %cst_8 = arith.constant dense<0.000000e+00> : vector<1xf32>
    %20 = vector.multi_reduction <add>, %19, %cst_8 [1] : vector<1x256xf32> to vector<1xf32>
    %21 = vector.shape_cast %20 : vector<1xf32> to vector<1x1xf32>
    %c0_9 = arith.constant 0 : index
    %c0_10 = arith.constant 0 : index
    %c0_11 = arith.constant 0 : index
    %c0_12 = arith.constant 0 : index
    %22 = vector.load %arg4[%c0_9, %c0_10, %c0_11, %c0_12] : memref<1x1x1x1xf32, #tpu.memory_space<vmem>>, vector<1x1x1x1xf32>
    %23 = vector.shape_cast %22 : vector<1x1x1x1xf32> to vector<1x1xf32>
    %24 = vector.shape_cast %21 : vector<1x1xf32> to vector<1x1x1x1xf32>
    tpu.vector_store %arg4[%c0_9, %c0_10, %c0_11, %c0_12], %24 {strides = array<i32>} : memref<1x1x1x1xf32, #tpu.memory_space<vmem>>, vector<1x1x1x1xf32>,
    return
  }
  func.func @transform_0(%arg0: i32, %arg1: i32) -> (i32, i32, i32) {
    %c0_i32 = arith.constant 0 : i32
    %c0_i32_0 = arith.constant 0 : i32
    return %arg0, %c0_i32, %arg1 : i32, i32, i32
  }
  func.func @transform_1(%arg0: i32, %arg1: i32) -> (i32, i32, i32) {
    %c0_i32 = arith.constant 0 : i32
    %c0_i32_0 = arith.constant 0 : i32
    return %arg0, %c0_i32, %arg1 : i32, i32, i32
  }
  func.func @transform_2(%arg0: i32, %arg1: i32) -> (i32, i32, i32, i32) {
    %c0_i32 = arith.constant 0 : i32
    %c0_i32_0 = arith.constant 0 : i32
    %c0_i32_1 = arith.constant 0 : i32
    return %arg0, %arg1, %c0_i32, %c0_i32_0 : i32, i32, i32, i32
  }
}

</mosaic_0001>

<bundles_post_ra>
// kernel: tpu_custom_call.1
= control target key start
LH: loop header
LB: loop body
LE: loop exit
PB: predicated region body
PF: predicated region fallthrough
CT: control target
= control target key end

     0   :  { %7 = vsyncpa [#allocation3], 0  ;;  %s807_s0 = inlined_call_operand.hbm [shape: f32[2,4,256], index: 0, kind: input, shape index: {}]   ;;  %s808_s1 = inlined_call_operand.hbm [shape: s32[2,1,256], index: 1, kind: input, shape index: {}]   ;;  %s809_s2 = inlined_call_operand.vmem [shape: f32[2,1,1,1], index: 2, kind: output, shape index: {}]  }
   0x1   :  { %9 = vsyncpa [#allocation3 + $0x1], 0 }
   0x2   :  { %10 = vsyncpa [#allocation5], 0 }
   0x3   :  { %12 = vsyncpa [#allocation5 + $0x1], 0  ;;  %s635_s9 = smov 0   ;;  %s637_s10 = smov 0  }
   0x4   :  { %s639_s11 = smov 0   ;;  %s641_s12 = smov 0  }
   0x5   :  { %s643_s13 = smov 0   ;;  %s645_s14 = smov 0  }
   0x6 LB: > { %s418_s15 = sadd.s32 4294967295, %s616_s14   ;;  %s30_s16 = sadd.s32 1, %s612_s13  ;;  %s616_s14 = sphi %s645_s14, %s18_s14   ;;  %s612_s13 = sphi %s643_s13, %s823_s13   ;;  %s608_s12 = sphi %s641_s12, %s822_s12   ;;  %s604_s11 = sphi %s639_s11, %s821_s11   ;;  %s600_s10 = sphi %s637_s10, %s820_s10   ;;  %s596_s9 = sphi %s635_s9, %s819_s9  }
   0x7   : > { %p32_p0 = scmp.ge.s32.totalorder %s30_s16, 2  ;;  %s39_s17 = sadd.s32 1, %s604_s11 }
   0x8   : > { %p46_p1 = scmp.ne.s32.totalorder %s604_s11, %s600_s10  ;;  %p47_p2 = scmp.eq.s32.totalorder %s616_s14, 0 }
   0x9   : > { %s825_s16 = smov (%p32_p0, %s30_s16), 0  ;;  %p52_p4 = scmp.ne.s32.totalorder %s600_s10, %s596_s9 }
   0xa   : > { %p671_p3 = por %p47_p2, %p46_p1  ;;  %s34_s19 = ssub.s32 %s612_s13, %s825_s16 }
   0xb   : > { %p53_p5 = scmp.eq.s32.totalorder %s418_s15, 0  ;;  %p37_p6 = scmp.eq.s32.totalorder %s34_s19, 0 }
   0xc   : > { %p446_p8 = scmp.lt.s32.totalorder %s616_s14, 2  ;;  %s687_s22 = sand.u32 1, %s604_s11  }
   0xd   : > { %p678_p7 = por %p53_p5, %p52_p4  ;;  %s433_s23 = sshll.u32 %s612_s13, 7 }
   0xe   : > { %s684_s21 = scalar_select %p37_p6, %s604_s11, %s39_s17  }
   0xf   : > { %s812_s20 = scalar_select %p678_p7, 1, 0 }
  0x10   : > { %s422_s24 = sshll.u32 %s687_s22, 3  ;;  %s694_s27 = scalar_lea.hbm %s807_s0, %s433_s23 }
  0x11   : > { %s136_s28 = scalar_lea.vmem [#allocation2], %s422_s24  ;;  %p698_p9 = pnand %p446_p8, %p671_p3 }
  0x12   : > { %s146_s29 = sshll.u32 %s136_s28, 4  ;;  %s133_s3 = scalar_lea.sflag [#allocation3], %s687_s22  ;;  %s702_s29 = int_to_ptr.vmem [resolvable:$true] %s146_s29 }
  0x13   : > { %s502_s4 = scalar_lea.hbm %s694_s27, 128  ;;  %p504_p13 = pneg %p698_p9 }
  0x14   : > { %p503_p12 = scmp.ne.s32.totalorder %s694_s27, %s502_s4  ;;  %s507_s7 = scalar_lea.hbm %s807_s0, 256 }
  0x15   : > { %p508_p2 = scmp.lt.u32.totalorder %s694_s27, %s807_s0  ;;  %p509_p3 = scmp.lt.u32.totalorder %s507_s7, %s502_s4 }
  0x16   : > { %p505_p0 = pnand %p504_p13, %p503_p12  ;;  %p511_p5 = scmp.lt.u32.totalorder %s502_s4, %s694_s27 }
  0x17   : > { %p510_p4 = por %p509_p3, %p508_p2 }
  0x18   : > { %p506_p1 = pneg %p505_p0 }
  0x19   : > { %p512_p6 = por %p511_p5, %p510_p4 }
  0x1b   : > { %p513_p8 = pnand %p512_p6, %p506_p1 }
  0x1d   : > { %516 = shalt.err (!%p513_p8)
}
  0x1e   : > { %s517_s15 = scalar_lea.vmem %s702_s29, 128  ;;  %s618_s17 = smov [#allocation2]  }
  0x1f   : > { %p518_p12 = scmp.ne.s32.totalorder %s702_s29, %s517_s15  ;;  %s522_s18 = sshll.u32 %s618_s17, 4  ;;  %s523_s18 = int_to_ptr.vmem [resolvable:$false] %s522_s18 }
  0x20   : > { %s524_s19 = scalar_lea.vmem %s523_s18, 256  ;;  %p525_p11 = scmp.lt.s32.totalorder %s702_s29, %s523_s18 }
  0x21   : > { %p520_p0 = pnand %p518_p12, %p504_p13  ;;  %p526_p2 = scmp.lt.s32.totalorder %s524_s19, %s517_s15 }
  0x23   : > { %p521_p10 = pneg %p520_p0  ;;  %p527_p3 = por %p526_p2, %p525_p11 }
  0x25   : > { %p528_p4 = pnand %p527_p3, %p521_p10 }
  0x27   : > { %531 = shalt.err (!%p528_p4)
}
  0x28   : > { %442 = dma.hbm_to_vmem [thread:$0]  (!%p698_p9), %s694_s27, 128, %s702_s29, %s133_s3  }
  0x29   : > { %p814_p1 = scmp.lt.s32.totalorder %s616_s14, 3  ;;  %p815_p5 = scmp.ge.s32.totalorder %s616_s14, 1 }
  0x2a   : > { %s425_s24 = sshll.u32 %s687_s22, 1  ;;  %s434_s25 = sshll.u32 %s612_s13, 5 }
  0x2b   : > { %p736_p6 = pnand %p815_p5, %p814_p1  ;;  %s745_s4 = scalar_lea.hbm %s808_s1, %s434_s25 }
  0x2c   : > { %s157_s5 = scalar_lea.vmem [#allocation4], %s425_s24  ;;  %s154_s27 = scalar_lea.sflag [#allocation5], %s687_s22 }
  0x2d   : > { %s816_s23 = scalar_select %p736_p6, 1, 0 }
  0x2e   : > { %s167_s6 = sshll.u32 %s157_s5, 4  ;;  %s532_s29 = scalar_lea.hbm %s745_s4, 32  ;;  %s168_s6 = int_to_ptr.vmem [resolvable:$true] %s167_s6 }
  0x2f   : > { %p533_p10 = scmp.ne.s32.totalorder %s745_s4, %s532_s29  ;;  %s537_s8 = scalar_lea.hbm %s808_s1, 64 }
  0x30   : > { %p538_p12 = scmp.lt.u32.totalorder %s745_s4, %s808_s1  ;;  %p539_p0 = scmp.lt.u32.totalorder %s537_s8, %s532_s29 }
  0x31   : > { %p535_p11 = pnand %p533_p10, %p504_p13  ;;  %p541_p3 = scmp.lt.u32.totalorder %s532_s29, %s745_s4 }
  0x32   : > { %p540_p2 = por %p539_p0, %p538_p12 }
  0x33   : > { %p536_p8 = pneg %p535_p11 }
  0x34   : > { %p542_p4 = por %p541_p3, %p540_p2 }
  0x36   : > { %p543_p1 = pnand %p542_p4, %p536_p8 }
  0x38   : > { %546 = shalt.err (!%p543_p1)
}
  0x39   : > { %s547_s22 = scalar_lea.vmem %s168_s6, 32  ;;  %s619_s17 = smov [#allocation4]  }
  0x3a   : > { %p548_p5 = scmp.ne.s32.totalorder %s168_s6, %s547_s22  ;;  %s552_s18 = sshll.u32 %s619_s17, 4  ;;  %s553_s18 = int_to_ptr.vmem [resolvable:$false] %s552_s18 }
  0x3b   : > { %s554_s19 = scalar_lea.vmem %s553_s18, 64  ;;  %p555_p7 = scmp.lt.s32.totalorder %s168_s6, %s553_s18 }
  0x3c   : > { %p550_p10 = pnand %p548_p5, %p504_p13  ;;  %p556_p6 = scmp.lt.s32.totalorder %s554_s19, %s547_s22 }
  0x3e   : > { %p551_p11 = pneg %p550_p10  ;;  %p557_p0 = por %p556_p6, %p555_p7 }
  0x40   : > { %p558_p12 = pnand %p557_p0, %p551_p11 }
  0x42   : > { %561 = shalt.err (!%p558_p12)
}
  0x43   : > { %445 = dma.hbm_to_vmem [thread:$0]  (!%p698_p9), %s745_s4, 32, %s168_s6, %s154_s27  }
  0x44   : > { %p817_p8 = scmp.ne.s32.totalorder %s816_s23, 0 }
  0x45   : > { %s178_s24 = sand.u32 (!%p817_p8), 1, %s600_s10   ;;  %p818_p13 = scmp.ne.s32.totalorder (!%p817_p8), %s812_s20, 0 }
  0x46   : > { %176 = sbr.rel (%p817_p8) target bundleno = 289 (0x121), region = 28  ;;  %s429_s25 = sshll.u32 (!%p817_p8), %s178_s24, 3 }
  0x47   : > { %s179_s26 = scalar_lea.sflag (!%p817_p8), [#allocation3], %s178_s24  ;;  %s182_s28 = scalar_lea.vmem (!%p817_p8), [#allocation2], %s429_s25 }
  0x4d   : > { %587 = dma.done.wait (%p818_p13), %s179_s26, 128  }
  0x4e   : > { %589 = vsyncadd (%p818_p13), %s179_s26, 4294967168  ;;  %s430_s5 = sshll.u32 %s178_s24, 1  ;;  %s188_s29 = scalar_lea.sflag [#allocation5], %s178_s24 }
  0x4f   : > { %s191_s30 = scalar_lea.vmem [#allocation4], %s430_s5 }
  0x50   : > { %591 = dma.done.wait (%p818_p13), %s188_s29, 32  }
  0x51   : > { %593 = vsyncadd (%p818_p13), %s188_s29, 4294967264  ;;  %vm231_vm0 = vcmask 1043456   ;;  %v226_v0 = vld [vmem:[%s182_s28] sm:$0xff]  ;;  %v274_v13 = vlaneseq  ;;  %v227_v21 = vld [vmem:[%s191_s30] sm:$0x3]  ;;  %p220_p7 = scmp.lt.s32.totalorder %s608_s12, 1 }
  0x52   : > { %v229_v1 = vcombine.high %v226_v0, %v226_v0  ;;  %v232_v2 = vsel %vm231_vm0, %v226_v0, -inf  ;;  %vm310_vm3 = vcmask 0  }
  0x53   : > { %v233_v3 = vrot.slane %v232_v2, 4  ;;  %v275_v17 = vshrl.u32 %v274_v13, 7  ;;  %s827_s12 = smov (!%p220_p7, %s608_s12), 1 }
  0x54   : > { %v239_v4 = vsel %vm231_vm0, %v229_v1, -inf  ;;  %s225_s4 = scalar_lea.vmem %s809_s2, %s827_s12 }
  0x55   : > { %v234_v5 = vmax.f32 %v232_v2, %v233_v3  ;;  %v240_v6 = vrot.slane %v239_v4, 4  ;;  %v278_v20 = vsub.s32 0, %v275_v17  ;;  %v282_v23 = vsub.s32 1, %v275_v17 }
  0x57   : > { %v235_v7 = vrot.slane %v234_v5, 2  ;;  %v241_v8 = vmax.f32 %v239_v4, %v240_v6  ;;  %v279_v24 = vrot.slane %v227_v21, %v278_v20  ;;  %v283_v25 = vrot.slane %v227_v21, %v282_v23 }
  0x59   : > { %v236_v9 = vmax.f32 %v234_v5, %v235_v7  ;;  %v242_v10 = vrot.slane %v241_v8, 2  ;;  %vm284_vm1 = vcmp.eq.s32.totalorder %v275_v17, %v279_v24  ;;  %vm285_vm2 = vcmp.eq.s32.totalorder %v275_v17, %v283_v25 }
  0x5b   : > { %v237_v11 = vrot.slane %v236_v9, 1  ;;  %v243_v12 = vmax.f32 %v241_v8, %v242_v10 }
  0x5d   : > { %v238_v14 = vmax.f32 %v236_v9, %v237_v11  ;;  %v244_v15 = vrot.slane %v243_v12, 1 }
  0x5f   : > { %v245_v16 = vmax.f32 %v243_v12, %v244_v15 }
  0x61   : > { %v248_v18 = vcombine.low %v238_v14, %v245_v16 }
  0x63   : > { %v250_v19 = vsub.f32 %v226_v0, %v248_v18 }
  0x65   : > { %v251_v22 = vmul.f32 1.442695, %v250_v19  ;;  %v287_v26 = vcombine.high %v250_v19, %v250_v19  ;;  %v289_v27 = vsel %vm284_vm1, %v250_v19, 0.0 }
  0x66   : > { %v291_v30 = vsel %vm231_vm0, %v289_v27, 0.0 }
  0x67   : > { %496 = vpow2.f32 %v251_v22  ;;  %v290_v28 = vsel %vm285_vm2, %v287_v26, 0.0  ;;  %v292_v36 = vrot.slane %v291_v30, 4 }
  0x68   : > { %v298_v34 = vsel %vm231_vm0, %v290_v28, 0.0 }
  0x69   : > { %v299_v39 = vrot.slane %v298_v34, 4  ;;  %v293_v42 = vadd.f32 %v292_v36, %v291_v30 }
  0x6b   : > { %v300_v45 = vadd.f32 %v299_v39, %v298_v34  ;;  %v294_v48 = vrot.slane %v293_v42, 2 }
  0x6d   : > { %v301_v51 = vrot.slane %v300_v45, 2  ;;  %v295_v53 = vadd.f32 %v294_v48, %v293_v42 }
  0x6f   : > { %v302_v54 = vadd.f32 %v301_v51, %v300_v45  ;;  %v296_v55 = vrot.slane %v295_v53, 1 }
  0x71   : > { %v497_v29 = vpop.eup %496  ;;  %v303_v56 = vrot.slane %v302_v54, 1  ;;  %v297_v57 = vadd.f32 %v296_v55, %v295_v53 }
  0x72   : > { %v254_v31 = vcombine.high %v497_v29, %v497_v29  ;;  %v256_v32 = vsel %vm231_vm0, %v497_v29, 0.0 }
  0x73   : > { %v257_v33 = vrot.slane %v256_v32, 4  ;;  %v304_v60 = vadd.f32 %v303_v56, %v302_v54 }
  0x74   : > { %v263_v35 = vsel %vm231_vm0, %v254_v31, 0.0 }
  0x75   : > { %v258_v37 = vadd.f32 %v257_v33, %v256_v32  ;;  %v264_v38 = vrot.slane %v263_v35, 4 }
  0x77   : > { %v259_v40 = vrot.slane %v258_v37, 2  ;;  %v265_v41 = vadd.f32 %v264_v38, %v263_v35 }
  0x79   : > { %v260_v43 = vadd.f32 %v259_v40, %v258_v37  ;;  %v266_v44 = vrot.slane %v265_v41, 2 }
  0x7b   : > { %v261_v46 = vrot.slane %v260_v43, 1  ;;  %v267_v47 = vadd.f32 %v266_v44, %v265_v41 }
  0x7d   : > { %v262_v49 = vadd.f32 %v261_v46, %v260_v43  ;;  %v268_v50 = vrot.slane %v267_v47, 1 }
  0x7f   : > { %v269_v52 = vadd.f32 %v268_v50, %v267_v47  ;;  %498 = vlog2.f32 %v262_v49 }
  0x81   : > { %500 = vlog2.f32 %v269_v52 }
  0x89   : > { %v499_v58 = vpop.eup %498 }
  0x8a   : > { %v271_v59 = vmul.f32 0.6931472, %v499_v58 }
  0x8b   : > { %v501_v61 = vpop.eup %500 }
  0x8c   : > { %v273_v62 = vmul.f32 0.6931472, %v501_v61  ;;  %v305_v63 = vsub.f32 %v271_v59, %v297_v57 }
  0x8e   : > { %v306_v0 = vsub.f32 %v273_v62, %v304_v60 }
  0x90   : > { %v307_v1 = vadd.f32 %v306_v0, %v305_v63 }
  0x92   : > { %308 = vadd.xlane.f32.xlu0 %v307_v1 }
 0x11f   : > { %v309_v2 = vpop.xlane.xlu0 %308 }
 0x120   : > { %311 = vst.msk [vmem:[%s225_s4] sm:$0x1] %vm310_vm3, %v309_v2 }
 0x121 PF: > { %s18_s14 = sadd.s32 1, %s616_s14   ;;  %s819_s9 = smov %s600_s10 }
 0x122   : > { %p15_p9 = scmp.ge.s32.totalorder %s18_s14, 4   ;;  %s820_s10 = smov %s604_s11 }
 0x123   : > { %s821_s11 = smov %s684_s21  ;;  %s822_s12 = smov %s612_s13 }
 0x124   : > { %s823_s13 = smov %s825_s16  ;;  %17 = sbr.rel (!%p15_p9) target bundleno = 6 (0x6), region = 81 }
 0x12b   :  { %335 = vsyncpa [#allocation3], 1 }
 0x12c   :  { %337 = vsyncpa [#allocation3 + $0x1], 1 }
 0x12d   :  { %338 = vsyncpa [#allocation5], 1 }
 0x12e   :  { %340 = vsyncpa [#allocation5 + $0x1], 1 }

</bundles_post_ra>
